<compile_context>
chip_gen: v7x
topology: tpu7x:2x2x1
jax: 0.10.0
libtpu: 0.0.40
codegen_flags: <defaults>
</compile_context>

<pallas_src>
import jax
import jax.numpy as jnp
from jax.experimental import pallas as pl
from jax.experimental.pallas import tpu as pltpu

STATE_SIZE = 4   # CartPole-v1 observation dim
H1 = 256
H2 = 128


def critic_kernel(x_ref, w1_ref, w2_ref, small_ref, out_ref):
    """One batch tile of the critic forward pass.

    small_ref packs the tiny operands into a single (8, 256) f32 tile:
      row 0 : fc1 bias (256 lanes)
      row 1 : fc2 bias in lanes [0:128]
      row 2 : fc3 weight as a row vector in lanes [0:128]
      row 3 : fc3 bias broadcast across the row
    """
    small = small_ref[...]
    b1 = small[0:1, :]          # (1, 256)
    b2 = small[1:2, :H2]        # (1, 128)
    w3 = small[2:3, :H2]        # (1, 128)
    b3 = small[3:4, 0:1]        # (1, 1)

    x = x_ref[...]              # (TB, 4)

    # fc1: K=4 contraction on the MXU (padding to the native tile is cheaper
    # than VPU broadcast-MACs; the MXU is otherwise idle here).
    h1 = jnp.dot(x, w1_ref[...], preferred_element_type=jnp.float32) + b1
    h1 = jnp.maximum(h1, 0.0)                                   # (TB, 256)

    # fc2: the dominant matmul, f32 accumulation on the MXU.
    h2 = jnp.dot(h1, w2_ref[...], preferred_element_type=jnp.float32) + b2
    h2 = jnp.maximum(h2, 0.0)                                   # (TB, 128)

    # fc3 (out_features=1): VPU multiply + lane reduction instead of an N=1
    # MXU matmul, removing the third MXU round-trip from the serial tail.
    v = jnp.sum(h2 * w3, axis=-1, keepdims=True) + b3           # (TB, 1)
    out_ref[...] = v.astype(out_ref.dtype)


def pack_small_operands(b1, b2, w3, b3):
    """Pack biases + fc3 weight into one (8, 256) tile -> single input DMA."""
    packed = jnp.zeros((8, H1), jnp.float32)
    packed = packed.at[0, :].set(b1.reshape(-1))
    packed = packed.at[1, :H2].set(b2.reshape(-1))
    packed = packed.at[2, :H2].set(w3.reshape(-1))
    packed = packed.at[3, :].set(jnp.full((H1,), b3.reshape(()), jnp.float32))
    return packed


def critic_forward(x, params, *, block_b=256):
    """x: (B, state_size) float32 -> (B, 1) float32 state value.

    Batch axis is a parallel grid (block_b rows per step; 256 fills the
    v6e/v7x MXU M dim). Weight BlockSpecs have constant index_maps so the
    weights are DMA'd once and stay resident across grid steps.
    """
    w1, b1, w2, b2, w3, b3 = params
    B = x.shape[0]
    small = pack_small_operands(b1, b2, w3, b3)

    # Tile the batch; pad up to a multiple of the block (min 8 f32 sublanes).
    tb = min(block_b, max(8, B))
    pad = (-B) % tb
    if pad:
        x = jnp.pad(x, ((0, pad), (0, 0)))
    bp = B + pad

    out = pl.pallas_call(
        critic_kernel,
        out_shape=jax.ShapeDtypeStruct((bp, 1), jnp.float32),
        grid_spec=pltpu.PrefetchScalarGridSpec(
            num_scalar_prefetch=0,
            grid=(bp // tb,),
            in_specs=[
                pl.BlockSpec((tb, STATE_SIZE), lambda i: (i, 0)),  # activations stream
                pl.BlockSpec((STATE_SIZE, H1), lambda i: (0, 0)),  # weights: resident
                pl.BlockSpec((H1, H2), lambda i: (0, 0)),
                pl.BlockSpec((8, H1), lambda i: (0, 0)),           # packed small operands
            ],
            out_specs=pl.BlockSpec((tb, 1), lambda i: (i, 0)),
        ),
        compiler_params=pltpu.CompilerParams(
            dimension_semantics=("parallel",),   # shard batch tiles across TCs (v7x)
        ),
    )(x, w1, w2, small)
    return out[:B] if pad else out


def init_params(key, state_size):
    """Deterministic init mimicking PyTorch Linear default (uniform +-1/sqrt(fan_in))."""
    def linear(key, fan_in, fan_out):
        kw, kb = jax.random.split(key)
        bound = 1.0 / jnp.sqrt(fan_in)
        w = jax.random.uniform(kw, (fan_in, fan_out), jnp.float32, -bound, bound)
        b = jax.random.uniform(kb, (1, fan_out), jnp.float32, -bound, bound)
        return w, b

    k1, k2, k3 = jax.random.split(key, 3)
    w1, b1 = linear(k1, state_size, H1)
    w2, b2 = linear(k2, H1, H2)
    w3, b3 = linear(k3, H2, 1)
    return (w1, b1, w2, b2, w3, b3)


def reference_forward(x, params):
    w1, b1, w2, b2, w3, b3 = params
    hp = jax.lax.Precision.HIGHEST
    h1 = jnp.maximum(jnp.dot(x, w1, precision=hp) + b1, 0.0)
    h2 = jnp.maximum(jnp.dot(h1, w2, precision=hp) + b2, 0.0)
    return jnp.dot(h2, w3, precision=hp) + b3


if __name__ == "__main__":
    state_size = STATE_SIZE   # CartPole-v1 observation space
    batch = 1024              # amortizes launch/DMA overhead; 4 parallel grid
                              # steps of 256 rows each (fills MXU M on v6e/v7x)

    key = jax.random.PRNGKey(0)
    kx, kp = jax.random.split(key)

    x = jax.random.normal(kx, (batch, state_size), jnp.float32)
    params = init_params(kp, state_size)

    out = critic_forward(x, params)
    out = jax.block_until_ready(out)

    ref = reference_forward(x, params)
    assert out.shape == (batch, 1), out.shape
    assert jnp.allclose(out, ref, atol=1e-4, rtol=1e-4), (out, ref)

    print("KERNEL_OK")
</pallas_src>

<mosaic_0001>
module attributes {stable_mosaic.version = 11 : i64} {
  func.func @critic_kernel(%arg0: i32, %arg1: memref<256x4xf32, #tpu.memory_space<vmem>>, %arg2: memref<4x256xf32, #tpu.memory_space<vmem>>, %arg3: memref<256x128xf32, #tpu.memory_space<vmem>>, %arg4: memref<8x256xf32, #tpu.memory_space<vmem>>, %arg5: memref<256x1xf32, #tpu.memory_space<vmem>>) attributes {dimension_semantics = [#tpu.dimension_semantics<parallel>], iteration_bounds = array<i64: 4>, scalar_prefetch = 0 : i64, scratch_operands = 0 : i64, tpu.core_type = #tpu.core_type<tc>, window_params = [{transform_indices = @transform_0, window_bounds = array<i64: 256, 4>}, {pipeline_mode = #tpu.pipeline_mode<synchronous>, transform_indices = @transform_1, window_bounds = array<i64: 4, 256>}, {pipeline_mode = #tpu.pipeline_mode<synchronous>, transform_indices = @transform_2, window_bounds = array<i64: 256, 128>}, {pipeline_mode = #tpu.pipeline_mode<synchronous>, transform_indices = @transform_3, window_bounds = array<i64: 8, 256>}, {transform_indices = @transform_4, window_bounds = array<i64: 256, 1>}]} {
    %c0 = arith.constant 0 : index
    %c0_0 = arith.constant 0 : index
    %0 = vector.load %arg4[%c0, %c0_0] : memref<8x256xf32, #tpu.memory_space<vmem>>, vector<8x256xf32>
    %1 = vector.extract_strided_slice %0 {offsets = [0, 0], sizes = [1, 256], strides = [1, 1]} : vector<8x256xf32> to vector<1x256xf32>
    %2 = vector.extract_strided_slice %0 {offsets = [1, 0], sizes = [1, 128], strides = [1, 1]} : vector<8x256xf32> to vector<1x128xf32>
    %3 = vector.extract_strided_slice %0 {offsets = [2, 0], sizes = [1, 128], strides = [1, 1]} : vector<8x256xf32> to vector<1x128xf32>
    %4 = vector.extract_strided_slice %0 {offsets = [3, 0], sizes = [1, 1], strides = [1, 1]} : vector<8x256xf32> to vector<1x1xf32>
    %c0_1 = arith.constant 0 : index
    %c0_2 = arith.constant 0 : index
    %5 = vector.load %arg1[%c0_1, %c0_2] : memref<256x4xf32, #tpu.memory_space<vmem>>, vector<256x4xf32>
    %c0_3 = arith.constant 0 : index
    %c0_4 = arith.constant 0 : index
    %6 = vector.load %arg2[%c0_3, %c0_4] : memref<4x256xf32, #tpu.memory_space<vmem>>, vector<4x256xf32>
    %cst = arith.constant dense<0.000000e+00> : vector<256x256xf32>
    %7 = tpu.matmul %5, %6, %cst {dimension_numbers = #tpu.dot_dimension_numbers<[1], [0], [0], [1], [0, 0, 1, 1], [], []>} : vector<256x4xf32>, vector<4x256xf32>, vector<256x256xf32> -> vector<256x256xf32>
    %8 = vector.broadcast %1 : vector<1x256xf32> to vector<256x256xf32>
    %9 = arith.addf %7, %8 : vector<256x256xf32>
    %cst_5 = arith.constant 0.000000e+00 : f32
    %10 = vector.broadcast %cst_5 : f32 to vector<256x256xf32>
    %11 = arith.maximumf %9, %10 : vector<256x256xf32>
    %c0_6 = arith.constant 0 : index
    %c0_7 = arith.constant 0 : index
    %12 = vector.load %arg3[%c0_6, %c0_7] : memref<256x128xf32, #tpu.memory_space<vmem>>, vector<256x128xf32>
    %cst_8 = arith.constant dense<0.000000e+00> : vector<256x128xf32>
    %13 = tpu.matmul %11, %12, %cst_8 {dimension_numbers = #tpu.dot_dimension_numbers<[1], [0], [0], [1], [0, 0, 1, 1], [], []>} : vector<256x256xf32>, vector<256x128xf32>, vector<256x128xf32> -> vector<256x128xf32>
    %14 = vector.broadcast %2 : vector<1x128xf32> to vector<256x128xf32>
    %15 = arith.addf %13, %14 : vector<256x128xf32>
    %cst_9 = arith.constant 0.000000e+00 : f32
    %16 = vector.broadcast %cst_9 : f32 to vector<256x128xf32>
    %17 = arith.maximumf %15, %16 : vector<256x128xf32>
    %18 = vector.broadcast %3 : vector<1x128xf32> to vector<256x128xf32>
    %19 = arith.mulf %17, %18 : vector<256x128xf32>
    %cst_10 = arith.constant dense<0.000000e+00> : vector<256xf32>
    %20 = vector.multi_reduction <add>, %19, %cst_10 [1] : vector<256x128xf32> to vector<256xf32>
    %21 = vector.shape_cast %20 : vector<256xf32> to vector<256x1xf32>
    %22 = vector.broadcast %4 : vector<1x1xf32> to vector<256x1xf32>
    %23 = arith.addf %21, %22 : vector<256x1xf32>
    %c0_11 = arith.constant 0 : index
    %c0_12 = arith.constant 0 : index
    %24 = vector.load %arg5[%c0_11, %c0_12] : memref<256x1xf32, #tpu.memory_space<vmem>>, vector<256x1xf32>
    tpu.vector_store %arg5[%c0_11, %c0_12], %23 {strides = array<i32>} : memref<256x1xf32, #tpu.memory_space<vmem>>, vector<256x1xf32>,
    return
  }
  func.func @transform_0(%arg0: i32) -> (i32, i32) {
    %c0_i32 = arith.constant 0 : i32
    %c0_i32_0 = arith.constant 0 : i32
    return %arg0, %c0_i32 : i32, i32
  }
  func.func @transform_1(%arg0: i32) -> (i32, i32) {
    %c0_i32 = arith.constant 0 : i32
    %c0_i32_0 = arith.constant 0 : i32
    %c0_i32_1 = arith.constant 0 : i32
    return %c0_i32, %c0_i32_0 : i32, i32
  }
  func.func @transform_2(%arg0: i32) -> (i32, i32) {
    %c0_i32 = arith.constant 0 : i32
    %c0_i32_0 = arith.constant 0 : i32
    %c0_i32_1 = arith.constant 0 : i32
    return %c0_i32, %c0_i32_0 : i32, i32
  }
  func.func @transform_3(%arg0: i32) -> (i32, i32) {
    %c0_i32 = arith.constant 0 : i32
    %c0_i32_0 = arith.constant 0 : i32
    %c0_i32_1 = arith.constant 0 : i32
    return %c0_i32, %c0_i32_0 : i32, i32
  }
  func.func @transform_4(%arg0: i32) -> (i32, i32) {
    %c0_i32 = arith.constant 0 : i32
    %c0_i32_0 = arith.constant 0 : i32
    return %arg0, %c0_i32 : i32, i32
  }
}

</mosaic_0001>

<bundles_post_ra>
// kernel: tpu_custom_call.1
= control target key start
LH: loop header
LB: loop body
LE: loop exit
PB: predicated region body
PF: predicated region fallthrough
CT: control target
= control target key end

     0   :  { %s1358_s15 = smov 0   ;;  %s1865_s0 = inlined_call_operand.vmem [shape: f32[1024,4], index: 0, kind: input, shape index: {}]   ;;  %s1866_s1 = inlined_call_operand.vmem [shape: f32[4,256], index: 1, kind: input, shape index: {}]   ;;  %s1867_s2 = inlined_call_operand.vmem [shape: f32[256,128], index: 2, kind: input, shape index: {}]   ;;  %s1868_s3 = inlined_call_operand.vmem [shape: f32[8,256], index: 3, kind: input, shape index: {}]   ;;  %s1869_s4 = inlined_call_operand.vmem [shape: f32[1024,1], index: 4, kind: output, shape index: {}]  }
   0x1 LB: > { %s1187_s16 = sadd.s32 4294967295, %s1329_s15   ;;  %p1191_p0 = scmp.ge.s32.totalorder %s1329_s15, 1  ;;  %s1329_s15 = sphi %s1358_s15, %s14_s15  }
   0x2   : > { %p163_p1 = scmp.lt.s32.totalorder %s1329_s15, 5 }
   0x4   : > { %p164_p2 = pnand %p1191_p0, %p163_p1 }
   0x5   : > { %v235_v0 = vld [vmem:[%s1866_s1] sm:$0xff] (!%p164_p2)  ;;  %vm343_vm0 = vcmask (!%p164_p2), 1043456   ;;  %s1192_s19 = sshll.u32 (!%p164_p2), %s1187_s16, 5  ;;  %v1331_v2 = vmov (!%p164_p2), 0.0   ;;  %v670_v4 = vld [vmem:[%s1867_s2 + $0x8] sm:$0xff] (!%p164_p2)  ;;  %vm246_vm1 = vcmask (!%p164_p2), 31744  }
   0x6   : > { %167 = sbr.rel (%p164_p2) target bundleno = 722 (0x2d2), region = 36  ;;  %v245_v1 = vcombine.high (!%p164_p2), %v235_v0, %v235_v0  ;;  %412 = vmatprep.mubr.f32.mxu0 (!%p164_p2), %v1331_v2  ;;  %p190_p3 = scmp.lt.s32.totalorder (!%p164_p2), %s1192_s19, 127  ;;  %v669_v3 = vld [vmem:[%s1867_s2] sm:$0xff] (!%p164_p2)  ;;  %v1332_v5 = vmov (!%p164_p2), 0.0|0.0   ;;  %v671_v7 = vld [vmem:[%s1867_s2 + $0x10] sm:$0xff] (!%p164_p2)  ;;  %v672_v8 = vld [vmem:[%s1867_s2 + $0x18] sm:$0xff] (!%p164_p2) }
   0x7   : > { %v1233_v6 = vpack.c.bf16 (!%p164_p2), %v670_v4, %v669_v3  ;;  %1280 = vmatprep.subr.bf16.mxu1 (!%p164_p2), %v1332_v5  ;;  %v1236_v11 = vpack.c.bf16 (!%p164_p2), %v672_v8, %v671_v7  ;;  %v673_v12 = vld [vmem:[%s1867_s2 + $0x20] sm:$0xff] (!%p164_p2)  ;;  %v674_v13 = vld [vmem:[%s1867_s2 + $0x28] sm:$0xff] (!%p164_p2)  ;;  %v675_v16 = vld [vmem:[%s1867_s2 + $0x30] sm:$0xff] (!%p164_p2)  ;;  %vm1098_vm2 = vcmask (!%p164_p2), 7168  }
   0x8   : > { %1196 = vmatprep.subr.msk.mxu0 (!%p164_p2), %vm343_vm0, %v245_v1  ;;  %v1239_v15 = vpack.c.bf16 (!%p164_p2), %v674_v13, %v673_v12  ;;  %v676_v17 = vld [vmem:[%s1867_s2 + $0x38] sm:$0xff] (!%p164_p2)  ;;  %v677_v20 = vld [vmem:[%s1867_s2 + $0x40] sm:$0xff] (!%p164_p2)  ;;  %v678_v21 = vld [vmem:[%s1867_s2 + $0x48] sm:$0xff] (!%p164_p2) }
   0x9   : > { %1197 = vmatpush1.msk.msra.mxu0 (!%p164_p2), %vm343_vm0, %v235_v0  ;;  %1296 = vmatpush1.bf16.msra.mxu1 (!%p164_p2), %v1233_v6  ;;  %v1242_v19 = vpack.c.bf16 (!%p164_p2), %v676_v17, %v675_v16  ;;  %v1245_v23 = vpack.c.bf16 (!%p164_p2), %v678_v21, %v677_v20  ;;  %v679_v24 = vld [vmem:[%s1867_s2 + $0x50] sm:$0xff] (!%p164_p2)  ;;  %v680_v25 = vld [vmem:[%s1867_s2 + $0x58] sm:$0xff] (!%p164_p2)  ;;  %v681_v28 = vld [vmem:[%s1867_s2 + $0x60] sm:$0xff] (!%p164_p2)  ;;  %v236_v21 = vlaneseq (!%p164_p2) }
   0xa   : > { %1232 = vmatprep.subr.bf16.mxu0 (!%p164_p2), %v1332_v5  ;;  %1281 = vmatprep.subr.bf16.mxu1 (!%p164_p2), %v1332_v5  ;;  %v1248_v27 = vpack.c.bf16 (!%p164_p2), %v680_v25, %v679_v24  ;;  %v682_v29 = vld [vmem:[%s1867_s2 + $0x68] sm:$0xff] (!%p164_p2)  ;;  %v683_v32 = vld [vmem:[%s1867_s2 + $0x70] sm:$0xff] (!%p164_p2)  ;;  %v684_v33 = vld [vmem:[%s1867_s2 + $0x78] sm:$0xff] (!%p164_p2) }
   0xb   : > { %v1251_v31 = vpack.c.bf16 (!%p164_p2), %v682_v29, %v681_v28  ;;  %v1254_v35 = vpack.c.bf16 (!%p164_p2), %v684_v33, %v683_v32  ;;  %v685_v36 = vld [vmem:[%s1867_s2 + $0x80] sm:$0xff] (!%p164_p2)  ;;  %v686_v37 = vld [vmem:[%s1867_s2 + $0x88] sm:$0xff] (!%p164_p2)  ;;  %v687_v40 = vld [vmem:[%s1867_s2 + $0x90] sm:$0xff] (!%p164_p2) }
   0xc   : > { %v1257_v39 = vpack.c.bf16 (!%p164_p2), %v686_v37, %v685_v36  ;;  %v688_v41 = vld [vmem:[%s1867_s2 + $0x98] sm:$0xff] (!%p164_p2)  ;;  %v689_v44 = vld [vmem:[%s1867_s2 + $0xa0] sm:$0xff] (!%p164_p2)  ;;  %v690_v45 = vld [vmem:[%s1867_s2 + $0xa8] sm:$0xff] (!%p164_p2) }
   0xd   : > { %s1871_s19 = smov (!%p190_p3, %s1192_s19), 127  ;;  %1297 = vmatpush1.bf16.msra.mxu1 %v1236_v11  ;;  %v1260_v43 = vpack.c.bf16 %v688_v41, %v687_v40  ;;  %v1263_v47 = vpack.c.bf16 %v690_v45, %v689_v44  ;;  %v691_v48 = vld [vmem:[%s1867_s2 + $0xb0] sm:$0xff]  ;;  %v692_v49 = vld [vmem:[%s1867_s2 + $0xb8] sm:$0xff]  ;;  %v693_v52 = vld [vmem:[%s1867_s2 + $0xc0] sm:$0xff] }
   0xe   : > { %s1193_s24 = sshll.u32 %s1871_s19, 3  ;;  %1282 = vmatprep.subr.bf16.mxu1 %v1332_v5  ;;  %v1266_v51 = vpack.c.bf16 %v692_v49, %v691_v48  ;;  %v694_v53 = vld [vmem:[%s1867_s2 + $0xc8] sm:$0xff]  ;;  %v695_v56 = vld [vmem:[%s1867_s2 + $0xd0] sm:$0xff]  ;;  %v696_v57 = vld [vmem:[%s1867_s2 + $0xd8] sm:$0xff] }
   0xf   : > { %s1386_s27 = scalar_lea.vmem %s1865_s0, %s1193_s24  ;;  %v1269_v55 = vpack.c.bf16 %v694_v53, %v693_v52  ;;  %v1272_v59 = vpack.c.bf16 %v696_v57, %v695_v56  ;;  %v697_v4 = vld [vmem:[%s1867_s2 + $0xe0] sm:$0xff]  ;;  %v202_v25 = vld [vmem:[%s1868_s3 + $0x8] sm:$0xff]  ;;  %s1764_s26 = scalar_lea.vmem %s1869_s4, %s1193_s24 }
  0x10   : > { %v203_v9 = vld [vmem:[%s1386_s27] sm:$0xff]  ;;  %v204_v10 = vld [vmem:[%s1386_s27 + $0x8] sm:$0xff]  ;;  %v205_v14 = vld [vmem:[%s1386_s27 + $0x10] sm:$0xff] }
  0x11   : > { %1198 = vmatmul.mubr.msk.f32.vlgmr.msra.gmra.mrb[0].mxu0 %vm246_vm1, %v203_v9  ;;  %1298 = vmatpush1.bf16.msra.mxu1 %v1239_v15  ;;  %v206_v18 = vld [vmem:[%s1386_s27 + $0x18] sm:$0xff]  ;;  %v207_v22 = vld [vmem:[%s1386_s27 + $0x20] sm:$0xff]  ;;  %v208_v26 = vld [vmem:[%s1386_s27 + $0x28] sm:$0xff] }
  0x12   : > { %418 = vmatprep.mubr.f32.mxu0 %v1331_v2  ;;  %1234 = vmatpush1.bf16.msra.mxu0 %v1233_v6  ;;  %v209_v30 = vld [vmem:[%s1386_s27 + $0x30] sm:$0xff]  ;;  %v210_v34 = vld [vmem:[%s1386_s27 + $0x38] sm:$0xff]  ;;  %v211_v38 = vld [vmem:[%s1386_s27 + $0x40] sm:$0xff] }
  0x13   : > { %1235 = vmatprep.subr.bf16.mxu0 %v1332_v5  ;;  %1283 = vmatprep.subr.bf16.mxu1 %v1332_v5  ;;  %v212_v42 = vld [vmem:[%s1386_s27 + $0x48] sm:$0xff]  ;;  %v213_v46 = vld [vmem:[%s1386_s27 + $0x50] sm:$0xff]  ;;  %v214_v50 = vld [vmem:[%s1386_s27 + $0x58] sm:$0xff] }
  0x14   : > { %v215_v54 = vld [vmem:[%s1386_s27 + $0x60] sm:$0xff]  ;;  %v216_v58 = vld [vmem:[%s1386_s27 + $0x68] sm:$0xff]  ;;  %v217_v60 = vld [vmem:[%s1386_s27 + $0x70] sm:$0xff] }
  0x15   : > { %1199 = vmatmul.mubr.msk.f32.gmra.mrb[2].mxu0 %vm246_vm1, %v204_v10  ;;  %1299 = vmatpush1.bf16.msra.mxu1 %v1242_v19  ;;  %v218_v61 = vld [vmem:[%s1386_s27 + $0x78] sm:$0xff]  ;;  %v219_v62 = vld [vmem:[%s1386_s27 + $0x80] sm:$0xff]  ;;  %v220_v63 = vld [vmem:[%s1386_s27 + $0x88] sm:$0xff] }
  0x16   : > { %424 = vmatprep.mubr.f32.mxu0 %v1331_v2  ;;  %1237 = vmatpush1.bf16.msra.mxu0 %v1236_v11  ;;  %v221_v0 = vld [vmem:[%s1386_s27 + $0x90] sm:$0xff]  ;;  %v222_v1 = vld [vmem:[%s1386_s27 + $0x98] sm:$0xff]  ;;  %v223_v3 = vld [vmem:[%s1386_s27 + $0xa0] sm:$0xff] }
  0x17   : > { %1238 = vmatprep.subr.bf16.mxu0 %v1332_v5  ;;  %1284 = vmatprep.subr.bf16.mxu1 %v1332_v5  ;;  %v698_v6 = vld [vmem:[%s1867_s2 + $0xe8] sm:$0xff]  ;;  %v699_v9 = vld [vmem:[%s1867_s2 + $0xf0] sm:$0xff]  ;;  %v700_v10 = vld [vmem:[%s1867_s2 + $0xf8] sm:$0xff] }
  0x18   : > { %v224_v7 = vld [vmem:[%s1386_s27 + $0xa8] sm:$0xff]  ;;  %v1275_v8 = vpack.c.bf16 %v698_v6, %v697_v4  ;;  %v225_v11 = vld [vmem:[%s1386_s27 + $0xb0] sm:$0xff]  ;;  %v1278_v12 = vpack.c.bf16 %v700_v10, %v699_v9  ;;  %v226_v13 = vld [vmem:[%s1386_s27 + $0xb8] sm:$0xff] }
  0x19   : > { %1200 = vmatmul.mubr.msk.f32.gmra.mrb[4].mxu0 %vm246_vm1, %v205_v14  ;;  %1300 = vmatpush1.bf16.msra.mxu1 %v1245_v23  ;;  %v227_v14 = vld [vmem:[%s1386_s27 + $0xc0] sm:$0xff]  ;;  %v230_v16 = vld [vmem:[%s1386_s27 + $0xd8] sm:$0xff] }
  0x1a   : > { %430 = vmatprep.mubr.f32.mxu0 %v1331_v2  ;;  %1240 = vmatpush1.bf16.msra.mxu0 %v1239_v15  ;;  %v229_v15 = vld [vmem:[%s1386_s27 + $0xd0] sm:$0xff]  ;;  %v231_v17 = vld [vmem:[%s1386_s27 + $0xe0] sm:$0xff]  ;;  %v234_v20 = vld [vmem:[%s1386_s27 + $0xf8] sm:$0xff] }
  0x1b   : > { %1241 = vmatprep.subr.bf16.mxu0 %v1332_v5  ;;  %1285 = vmatprep.subr.bf16.mxu1 %v1332_v5  ;;  %v1609_v24 = vld [vmem:[%s1868_s3] sm:$0xff] }
  0x1d   : > { %1201 = vmatmul.mubr.msk.f32.gmra.mrb[6].mxu0 %vm246_vm1, %v206_v18  ;;  %1301 = vmatpush1.bf16.msra.mxu1 %v1248_v27  ;;  %v232_v18 = vld [vmem:[%s1386_s27 + $0xe8] sm:$0xff] }
  0x1e   : > { %436 = vmatprep.mubr.f32.mxu0 %v1331_v2  ;;  %1243 = vmatpush1.bf16.msra.mxu0 %v1242_v19  ;;  %v233_v19 = vld [vmem:[%s1386_s27 + $0xf0] sm:$0xff] }
  0x1f   : > { %1244 = vmatprep.subr.bf16.mxu0 %v1332_v5  ;;  %1286 = vmatprep.subr.bf16.mxu1 %v1332_v5 }
  0x21   : > { %1202 = vmatmul.mubr.msk.f32.gmra.mrb[8].mxu0 %vm246_vm1, %v207_v22  ;;  %1302 = vmatpush1.bf16.msra.mxu1 %v1251_v31  ;;  %v1603_v22 = vshrl.u32 %v236_v21, 7 }
  0x22   : > { %442 = vmatprep.mubr.f32.mxu0 %v1331_v2  ;;  %1246 = vmatpush1.bf16.msra.mxu0 %v1245_v23 }
  0x23   : > { %1247 = vmatprep.subr.bf16.mxu0 %v1332_v5  ;;  %1287 = vmatprep.subr.bf16.mxu1 %v1332_v5  ;;  %v238_v23 = vsub.s32 0, %v1603_v22 }
  0x25   : > { %1203 = vmatmul.mubr.msk.f32.gmra.mrb[10].mxu0 %vm246_vm1, %v208_v26  ;;  %1303 = vmatpush1.bf16.msra.mxu1 %v1254_v35  ;;  %v1615_v26 = vrot.slane %v1609_v24, %v238_v23 }
  0x26   : > { %448 = vmatprep.mubr.f32.mxu0 %v1331_v2  ;;  %1249 = vmatpush1.bf16.msra.mxu0 %v1248_v27 }
  0x27   : > { %1250 = vmatprep.subr.bf16.mxu0 %v1332_v5  ;;  %1288 = vmatprep.subr.bf16.mxu1 %v1332_v5 }
  0x29   : > { %1204 = vmatmul.mubr.msk.f32.gmra.mrb[12].mxu0 %vm246_vm1, %v209_v30  ;;  %1304 = vmatpush1.bf16.msra.mxu1 %v1257_v39 }
  0x2a   : > { %454 = vmatprep.mubr.f32.mxu0 %v1331_v2  ;;  %1252 = vmatpush1.bf16.msra.mxu0 %v1251_v31 }
  0x2b   : > { %1253 = vmatprep.subr.bf16.mxu0 %v1332_v5  ;;  %1289 = vmatprep.subr.bf16.mxu1 %v1332_v5 }
  0x2d   : > { %1205 = vmatmul.mubr.msk.f32.gmra.mrb[14].mxu0 %vm246_vm1, %v210_v34  ;;  %1305 = vmatpush1.bf16.msra.mxu1 %v1260_v43 }
  0x2e   : > { %460 = vmatprep.mubr.f32.mxu0 %v1331_v2  ;;  %1255 = vmatpush1.bf16.msra.mxu0 %v1254_v35 }
  0x2f   : > { %1256 = vmatprep.subr.bf16.mxu0 %v1332_v5  ;;  %1290 = vmatprep.subr.bf16.mxu1 %v1332_v5 }
  0x31   : > { %1206 = vmatmul.mubr.msk.f32.gmra.mrb[16].mxu0 %vm246_vm1, %v211_v38  ;;  %1306 = vmatpush1.bf16.msra.mxu1 %v1263_v47 }
  0x32   : > { %466 = vmatprep.mubr.f32.mxu0 %v1331_v2  ;;  %1258 = vmatpush1.bf16.msra.mxu0 %v1257_v39 }
  0x33   : > { %1259 = vmatprep.subr.bf16.mxu0 %v1332_v5  ;;  %1291 = vmatprep.subr.bf16.mxu1 %v1332_v5 }
  0x35   : > { %1207 = vmatmul.mubr.msk.f32.gmra.mrb[18].mxu0 %vm246_vm1, %v212_v42  ;;  %1307 = vmatpush1.bf16.msra.mxu1 %v1266_v51 }
  0x36   : > { %472 = vmatprep.mubr.f32.mxu0 %v1331_v2  ;;  %1261 = vmatpush1.bf16.msra.mxu0 %v1260_v43 }
  0x37   : > { %1262 = vmatprep.subr.bf16.mxu0 %v1332_v5  ;;  %1292 = vmatprep.subr.bf16.mxu1 %v1332_v5 }
  0x39   : > { %1208 = vmatmul.mubr.msk.f32.gmra.mrb[20].mxu0 %vm246_vm1, %v213_v46  ;;  %1308 = vmatpush1.bf16.msra.mxu1 %v1269_v55 }
  0x3a   : > { %478 = vmatprep.mubr.f32.mxu0 %v1331_v2  ;;  %1264 = vmatpush1.bf16.msra.mxu0 %v1263_v47 }
  0x3b   : > { %1265 = vmatprep.subr.bf16.mxu0 %v1332_v5  ;;  %1293 = vmatprep.subr.bf16.mxu1 %v1332_v5 }
  0x3d   : > { %1209 = vmatmul.mubr.msk.f32.gmra.mrb[22].mxu0 %vm246_vm1, %v214_v50  ;;  %1309 = vmatpush1.bf16.msra.mxu1 %v1272_v59 }
  0x3e   : > { %484 = vmatprep.mubr.f32.mxu0 %v1331_v2  ;;  %1267 = vmatpush1.bf16.msra.mxu0 %v1266_v51 }
  0x3f   : > { %1268 = vmatprep.subr.bf16.mxu0 %v1332_v5  ;;  %1294 = vmatprep.subr.bf16.mxu1 %v1332_v5 }
  0x41   : > { %1210 = vmatmul.mubr.msk.f32.gmra.mrb[24].mxu0 %vm246_vm1, %v215_v54  ;;  %1310 = vmatpush1.bf16.msra.mxu1 %v1275_v8 }
  0x42   : > { %490 = vmatprep.mubr.f32.mxu0 %v1331_v2  ;;  %1270 = vmatpush1.bf16.msra.mxu0 %v1269_v55 }
  0x43   : > { %1271 = vmatprep.subr.bf16.mxu0 %v1332_v5  ;;  %1295 = vmatprep.subr.bf16.mxu1 %v1332_v5 }
  0x45   : > { %1211 = vmatmul.mubr.msk.f32.gmra.mrb[26].mxu0 %vm246_vm1, %v216_v58  ;;  %1311 = vmatpush1.bf16.msra.mxu1 %v1278_v12 }
  0x46   : > { %496 = vmatprep.mubr.f32.mxu0 %v1331_v2  ;;  %1273 = vmatpush1.bf16.msra.mxu0 %v1272_v59 }
  0x47   : > { %1274 = vmatprep.subr.bf16.mxu0 %v1332_v5 }
  0x49   : > { %1212 = vmatmul.mubr.msk.f32.gmra.mrb[28].mxu0 %vm246_vm1, %v217_v60 }
  0x4a   : > { %502 = vmatprep.mubr.f32.mxu0 %v1331_v2  ;;  %1276 = vmatpush1.bf16.msra.mxu0 %v1275_v8 }
  0x4b   : > { %1277 = vmatprep.subr.bf16.mxu0 %v1332_v5  ;;  %v228_v5 = vld [vmem:[%s1386_s27 + $0xc8] sm:$0xff] }
  0x4d   : > { %1213 = vmatmul.mubr.msk.f32.gmra.mrb[30].mxu0 %vm246_vm1, %v218_v61 }
  0x4e   : > { %508 = vmatprep.mubr.f32.mxu0 %v1331_v2  ;;  %1279 = vmatpush1.bf16.msra.mxu0 %v1278_v12 }
  0x51   : > { %1214 = vmatmul.mubr.msk.f32.gmra.mrb[32].mxu0 %vm246_vm1, %v219_v62 }
  0x52   : > { %514 = vmatprep.mubr.f32.mxu0 %v1331_v2 }
  0x55   : > { %1215 = vmatmul.mubr.msk.f32.gmra.mrb[34].mxu0 %vm246_vm1, %v220_v63 }
  0x56   : > { %520 = vmatprep.mubr.f32.mxu0 %v1331_v2 }
  0x59   : > { %1216 = vmatmul.mubr.msk.f32.gmra.mrb[36].mxu0 %vm246_vm1, %v221_v0 }
  0x5a   : > { %526 = vmatprep.mubr.f32.mxu0 %v1331_v2 }
  0x5d   : > { %1217 = vmatmul.mubr.msk.f32.gmra.mrb[38].mxu0 %vm246_vm1, %v222_v1 }
  0x5e   : > { %532 = vmatprep.mubr.f32.mxu0 %v1331_v2 }
  0x61   : > { %1218 = vmatmul.mubr.msk.f32.gmra.mrb[40].mxu0 %vm246_vm1, %v223_v3 }
  0x62   : > { %538 = vmatprep.mubr.f32.mxu0 %v1331_v2 }
  0x65   : > { %1219 = vmatmul.mubr.msk.f32.gmra.mrb[42].mxu0 %vm246_vm1, %v224_v7 }
  0x66   : > { %544 = vmatprep.mubr.f32.mxu0 %v1331_v2 }
  0x69   : > { %1220 = vmatmul.mubr.msk.f32.gmra.mrb[44].mxu0 %vm246_vm1, %v225_v11 }
  0x6a   : > { %550 = vmatprep.mubr.f32.mxu0 %v1331_v2 }
  0x6d   : > { %1221 = vmatmul.mubr.msk.f32.gmra.mrb[46].mxu0 %vm246_vm1, %v226_v13 }
  0x6e   : > { %556 = vmatprep.mubr.f32.mxu0 %v1331_v2 }
  0x71   : > { %1222 = vmatmul.mubr.msk.f32.gmra.mrb[48].mxu0 %vm246_vm1, %v227_v14 }
  0x72   : > { %562 = vmatprep.mubr.f32.mxu0 %v1331_v2 }
  0x75   : > { %1223 = vmatmul.mubr.msk.f32.gmra.mrb[50].mxu0 %vm246_vm1, %v228_v5 }
  0x76   : > { %568 = vmatprep.mubr.f32.mxu0 %v1331_v2 }
  0x79   : > { %1224 = vmatmul.mubr.msk.f32.gmra.mrb[52].mxu0 %vm246_vm1, %v229_v15 }
  0x7a   : > { %574 = vmatprep.mubr.f32.mxu0 %v1331_v2 }
  0x7d   : > { %1225 = vmatmul.mubr.msk.f32.gmra.mrb[54].mxu0 %vm246_vm1, %v230_v16 }
  0x7e   : > { %580 = vmatprep.mubr.f32.mxu0 %v1331_v2 }
  0x81   : > { %1226 = vmatmul.mubr.msk.f32.gmra.mrb[56].mxu0 %vm246_vm1, %v231_v17 }
  0x82   : > { %586 = vmatprep.mubr.f32.mxu0 %v1331_v2 }
  0x85   : > { %1227 = vmatmul.mubr.msk.f32.gmra.mrb[58].mxu0 %vm246_vm1, %v232_v18 }
  0x86   : > { %592 = vmatprep.mubr.f32.mxu0 %v1331_v2 }
  0x89   : > { %1228 = vmatmul.mubr.msk.f32.gmra.mrb[60].mxu0 %vm246_vm1, %v233_v19 }
  0x8a   : > { %598 = vmatprep.mubr.f32.mxu0 %v1331_v2  ;;  %v1617_v2 = vrot.slane %v202_v25, %v238_v23 }
  0x8d   : > { %1229 = vmatmul.mubr.msk.f32.gmra.mrb[62].mxu0 %vm246_vm1, %v234_v20 }
  0xe4   : > { %v414_v27 = vpop.f32.mrb[0].mxu0 }
  0xe5   : > { %v415_v28 = vadd.f32 %v414_v27, %v1615_v26  ;;  %v416_v29 = vpop.f32.mrb[1].mxu0 }
  0xe6   : > { %v417_v30 = vadd.f32 %v416_v29, %v1617_v2 }
  0xe7   : > { %v605_v33 = vmax.f32 %v415_v28, 0.0 }
  0xe8   : > { %v606_v31 = vmax.f32 %v417_v30, 0.0  ;;  %v420_v32 = vpop.f32.mrb[2].mxu0 }
  0xe9   : > { %v421_v34 = vadd.f32 %v420_v32, %v1615_v26  ;;  %v422_v35 = vpop.f32.mrb[3].mxu0 }
  0xea   : > { %v423_v36 = vadd.f32 %v422_v35, %v1617_v2  ;;  %769 = vmatprep.mubr.f32.mxu0 %v606_v31 }
  0xeb   : > { %770 = vmatmul.mubr.f32.vlgmr.msra.gmra.mrb[64].mxu0 %v605_v33  ;;  %v607_v39 = vmax.f32 %v421_v34, 0.0 }
  0xec   : > { %v608_v37 = vmax.f32 %v423_v36, 0.0  ;;  %v426_v38 = vpop.f32.mrb[4].mxu0 }
  0xed   : > { %v427_v40 = vadd.f32 %v426_v38, %v1615_v26  ;;  %v428_v41 = vpop.f32.mrb[5].mxu0 }
  0xee   : > { %v429_v42 = vadd.f32 %v428_v41, %v1617_v2  ;;  %774 = vmatprep.mubr.f32.mxu0 %v608_v37 }
  0xef   : > { %775 = vmatmul.mubr.f32.gmra.mrb[66].mxu0 %v607_v39  ;;  %v609_v45 = vmax.f32 %v427_v40, 0.0 }
  0xf0   : > { %v610_v43 = vmax.f32 %v429_v42, 0.0  ;;  %v432_v44 = vpop.f32.mrb[6].mxu0 }
  0xf1   : > { %v433_v46 = vadd.f32 %v432_v44, %v1615_v26  ;;  %v434_v47 = vpop.f32.mrb[7].mxu0 }
  0xf2   : > { %v435_v48 = vadd.f32 %v434_v47, %v1617_v2  ;;  %779 = vmatprep.mubr.f32.mxu0 %v610_v43 }
  0xf3   : > { %780 = vmatmul.mubr.f32.gmra.mrb[68].mxu0 %v609_v45  ;;  %v611_v51 = vmax.f32 %v433_v46, 0.0 }
  0xf4   : > { %v612_v49 = vmax.f32 %v435_v48, 0.0  ;;  %v438_v50 = vpop.f32.mrb[8].mxu0 }
  0xf5   : > { %v439_v52 = vadd.f32 %v438_v50, %v1615_v26  ;;  %v440_v53 = vpop.f32.mrb[9].mxu0 }
  0xf6   : > { %v441_v54 = vadd.f32 %v440_v53, %v1617_v2  ;;  %784 = vmatprep.mubr.f32.mxu0 %v612_v49 }
  0xf7   : > { %785 = vmatmul.mubr.f32.gmra.mrb[70].mxu0 %v611_v51  ;;  %v613_v57 = vmax.f32 %v439_v52, 0.0 }
  0xf8   : > { %v614_v55 = vmax.f32 %v441_v54, 0.0  ;;  %v444_v56 = vpop.f32.mrb[10].mxu0 }
  0xf9   : > { %v445_v58 = vadd.f32 %v444_v56, %v1615_v26  ;;  %v446_v59 = vpop.f32.mrb[11].mxu0 }
  0xfa   : > { %v447_v60 = vadd.f32 %v446_v59, %v1617_v2  ;;  %789 = vmatprep.mubr.f32.mxu0 %v614_v55 }
  0xfb   : > { %790 = vmatmul.mubr.f32.gmra.mrb[72].mxu0 %v613_v57  ;;  %v615_v63 = vmax.f32 %v445_v58, 0.0 }
  0xfc   : > { %v616_v61 = vmax.f32 %v447_v60, 0.0  ;;  %v450_v62 = vpop.f32.mrb[12].mxu0 }
  0xfd   : > { %v451_v0 = vadd.f32 %v450_v62, %v1615_v26  ;;  %v452_v1 = vpop.f32.mrb[13].mxu0 }
  0xfe   : > { %v453_v3 = vadd.f32 %v452_v1, %v1617_v2  ;;  %794 = vmatprep.mubr.f32.mxu0 %v616_v61 }
  0xff   : > { %795 = vmatmul.mubr.f32.gmra.mrb[74].mxu0 %v615_v63  ;;  %v617_v7 = vmax.f32 %v451_v0, 0.0 }
 0x100   : > { %v618_v4 = vmax.f32 %v453_v3, 0.0  ;;  %v456_v6 = vpop.f32.mrb[14].mxu0 }
 0x101   : > { %v457_v8 = vadd.f32 %v456_v6, %v1615_v26  ;;  %v458_v9 = vpop.f32.mrb[15].mxu0 }
 0x102   : > { %799 = vmatprep.mubr.f32.mxu0 %v618_v4  ;;  %v459_v10 = vadd.f32 %v458_v9, %v1617_v2 }
 0x103   : > { %800 = vmatmul.mubr.f32.gmra.mrb[76].mxu0 %v617_v7  ;;  %v619_v13 = vmax.f32 %v457_v8, 0.0 }
 0x104   : > { %v462_v11 = vpop.f32.mrb[16].mxu0  ;;  %v620_v12 = vmax.f32 %v459_v10, 0.0 }
 0x105   : > { %v463_v14 = vadd.f32 %v462_v11, %v1615_v26  ;;  %v464_v5 = vpop.f32.mrb[17].mxu0 }
 0x106   : > { %v465_v15 = vadd.f32 %v464_v5, %v1617_v2  ;;  %804 = vmatprep.mubr.f32.mxu1 %v620_v12 }
 0x107   : > { %805 = vmatmul.mubr.f32.vlgmr.msra.gmra.mrb[0].mxu1 %v619_v13  ;;  %v621_v18 = vmax.f32 %v463_v14, 0.0 }
 0x108   : > { %v622_v16 = vmax.f32 %v465_v15, 0.0  ;;  %v468_v17 = vpop.f32.mrb[18].mxu0 }
 0x109   : > { %v469_v19 = vadd.f32 %v468_v17, %v1615_v26  ;;  %v470_v20 = vpop.f32.mrb[19].mxu0 }
 0x10a   : > { %v471_v21 = vadd.f32 %v470_v20, %v1617_v2  ;;  %809 = vmatprep.mubr.f32.mxu1 %v622_v16 }
 0x10b   : > { %810 = vmatmul.mubr.f32.gmra.mrb[2].mxu1 %v621_v18  ;;  %v623_v27 = vmax.f32 %v469_v19, 0.0 }
 0x10c   : > { %v624_v23 = vmax.f32 %v471_v21, 0.0  ;;  %v474_v25 = vpop.f32.mrb[20].mxu0 }
 0x10d   : > { %v475_v28 = vadd.f32 %v474_v25, %v1615_v26  ;;  %v476_v29 = vpop.f32.mrb[21].mxu0 }
 0x10e   : > { %v477_v30 = vadd.f32 %v476_v29, %v1617_v2  ;;  %814 = vmatprep.mubr.f32.mxu1 %v624_v23 }
 0x10f   : > { %815 = vmatmul.mubr.f32.gmra.mrb[4].mxu1 %v623_v27  ;;  %v625_v33 = vmax.f32 %v475_v28, 0.0 }
 0x110   : > { %v626_v31 = vmax.f32 %v477_v30, 0.0  ;;  %v480_v32 = vpop.f32.mrb[22].mxu0 }
 0x111   : > { %v481_v34 = vadd.f32 %v480_v32, %v1615_v26  ;;  %v482_v35 = vpop.f32.mrb[23].mxu0 }
 0x112   : > { %v483_v36 = vadd.f32 %v482_v35, %v1617_v2  ;;  %819 = vmatprep.mubr.f32.mxu1 %v626_v31 }
 0x113   : > { %820 = vmatmul.mubr.f32.gmra.mrb[6].mxu1 %v625_v33  ;;  %v627_v39 = vmax.f32 %v481_v34, 0.0 }
 0x114   : > { %v628_v37 = vmax.f32 %v483_v36, 0.0  ;;  %v486_v38 = vpop.f32.mrb[24].mxu0 }
 0x115   : > { %v487_v40 = vadd.f32 %v486_v38, %v1615_v26  ;;  %v488_v41 = vpop.f32.mrb[25].mxu0 }
 0x116   : > { %v489_v42 = vadd.f32 %v488_v41, %v1617_v2  ;;  %824 = vmatprep.mubr.f32.mxu1 %v628_v37 }
 0x117   : > { %825 = vmatmul.mubr.f32.gmra.mrb[8].mxu1 %v627_v39  ;;  %v629_v45 = vmax.f32 %v487_v40, 0.0 }
 0x118   : > { %v630_v43 = vmax.f32 %v489_v42, 0.0  ;;  %v492_v44 = vpop.f32.mrb[26].mxu0 }
 0x119   : > { %v493_v46 = vadd.f32 %v492_v44, %v1615_v26  ;;  %v494_v47 = vpop.f32.mrb[27].mxu0 }
 0x11a   : > { %v495_v48 = vadd.f32 %v494_v47, %v1617_v2  ;;  %829 = vmatprep.mubr.f32.mxu1 %v630_v43 }
 0x11b   : > { %830 = vmatmul.mubr.f32.gmra.mrb[10].mxu1 %v629_v45  ;;  %v631_v51 = vmax.f32 %v493_v46, 0.0 }
 0x11c   : > { %v632_v49 = vmax.f32 %v495_v48, 0.0  ;;  %v498_v50 = vpop.f32.mrb[28].mxu0 }
 0x11d   : > { %v499_v52 = vadd.f32 %v498_v50, %v1615_v26  ;;  %v500_v53 = vpop.f32.mrb[29].mxu0 }
 0x11e   : > { %v501_v54 = vadd.f32 %v500_v53, %v1617_v2  ;;  %834 = vmatprep.mubr.f32.mxu1 %v632_v49 }
 0x11f   : > { %835 = vmatmul.mubr.f32.gmra.mrb[12].mxu1 %v631_v51  ;;  %v633_v57 = vmax.f32 %v499_v52, 0.0 }
 0x120   : > { %v634_v55 = vmax.f32 %v501_v54, 0.0  ;;  %v504_v56 = vpop.f32.mrb[30].mxu0 }
 0x121   : > { %v505_v58 = vadd.f32 %v504_v56, %v1615_v26  ;;  %v506_v59 = vpop.f32.mrb[31].mxu0 }
 0x122   : > { %v507_v60 = vadd.f32 %v506_v59, %v1617_v2  ;;  %839 = vmatprep.mubr.f32.mxu1 %v634_v55 }
 0x123   : > { %840 = vmatmul.mubr.f32.gmra.mrb[14].mxu1 %v633_v57  ;;  %v635_v63 = vmax.f32 %v505_v58, 0.0 }
 0x124   : > { %v636_v61 = vmax.f32 %v507_v60, 0.0  ;;  %v510_v62 = vpop.f32.mrb[32].mxu0 }
 0x125   : > { %v511_v0 = vadd.f32 %v510_v62, %v1615_v26  ;;  %v512_v1 = vpop.f32.mrb[33].mxu0 }
 0x126   : > { %v513_v3 = vadd.f32 %v512_v1, %v1617_v2  ;;  %844 = vmatprep.mubr.f32.mxu1 %v636_v61 }
 0x127   : > { %845 = vmatmul.mubr.f32.gmra.mrb[16].mxu1 %v635_v63  ;;  %v637_v7 = vmax.f32 %v511_v0, 0.0 }
 0x128   : > { %v638_v4 = vmax.f32 %v513_v3, 0.0  ;;  %v516_v6 = vpop.f32.mrb[34].mxu0 }
 0x129   : > { %v517_v8 = vadd.f32 %v516_v6, %v1615_v26  ;;  %v518_v9 = vpop.f32.mrb[35].mxu0 }
 0x12a   : > { %v519_v10 = vadd.f32 %v518_v9, %v1617_v2  ;;  %849 = vmatprep.mubr.f32.mxu1 %v638_v4 }
 0x12b   : > { %850 = vmatmul.mubr.f32.gmra.mrb[18].mxu1 %v637_v7  ;;  %v639_v13 = vmax.f32 %v517_v8, 0.0 }
 0x12c   : > { %v640_v11 = vmax.f32 %v519_v10, 0.0  ;;  %v522_v12 = vpop.f32.mrb[36].mxu0 }
 0x12d   : > { %v523_v14 = vadd.f32 %v522_v12, %v1615_v26  ;;  %v524_v5 = vpop.f32.mrb[37].mxu0 }
 0x12e   : > { %v525_v15 = vadd.f32 %v524_v5, %v1617_v2  ;;  %854 = vmatprep.mubr.f32.mxu1 %v640_v11 }
 0x12f   : > { %855 = vmatmul.mubr.f32.gmra.mrb[20].mxu1 %v639_v13  ;;  %v641_v18 = vmax.f32 %v523_v14, 0.0 }
 0x130   : > { %v642_v16 = vmax.f32 %v525_v15, 0.0  ;;  %v528_v17 = vpop.f32.mrb[38].mxu0 }
 0x131   : > { %v529_v19 = vadd.f32 %v528_v17, %v1615_v26  ;;  %v530_v20 = vpop.f32.mrb[39].mxu0 }
 0x132   : > { %v531_v21 = vadd.f32 %v530_v20, %v1617_v2  ;;  %859 = vmatprep.mubr.f32.mxu1 %v642_v16 }
 0x133   : > { %860 = vmatmul.mubr.f32.gmra.mrb[22].mxu1 %v641_v18  ;;  %v643_v27 = vmax.f32 %v529_v19, 0.0 }
 0x134   : > { %v644_v23 = vmax.f32 %v531_v21, 0.0  ;;  %v534_v25 = vpop.f32.mrb[40].mxu0 }
 0x135   : > { %v535_v28 = vadd.f32 %v534_v25, %v1615_v26  ;;  %v536_v29 = vpop.f32.mrb[41].mxu0 }
 0x136   : > { %v537_v30 = vadd.f32 %v536_v29, %v1617_v2  ;;  %864 = vmatprep.mubr.f32.mxu1 %v644_v23 }
 0x137   : > { %865 = vmatmul.mubr.f32.gmra.mrb[24].mxu1 %v643_v27  ;;  %v645_v33 = vmax.f32 %v535_v28, 0.0 }
 0x138   : > { %v646_v31 = vmax.f32 %v537_v30, 0.0  ;;  %v540_v32 = vpop.f32.mrb[42].mxu0 }
 0x139   : > { %v541_v34 = vadd.f32 %v540_v32, %v1615_v26  ;;  %v542_v35 = vpop.f32.mrb[43].mxu0 }
 0x13a   : > { %v543_v36 = vadd.f32 %v542_v35, %v1617_v2  ;;  %869 = vmatprep.mubr.f32.mxu1 %v646_v31 }
 0x13b   : > { %870 = vmatmul.mubr.f32.gmra.mrb[26].mxu1 %v645_v33  ;;  %v647_v39 = vmax.f32 %v541_v34, 0.0 }
 0x13c   : > { %v648_v37 = vmax.f32 %v543_v36, 0.0  ;;  %v546_v38 = vpop.f32.mrb[44].mxu0 }
 0x13d   : > { %v547_v40 = vadd.f32 %v546_v38, %v1615_v26  ;;  %v548_v41 = vpop.f32.mrb[45].mxu0 }
 0x13e   : > { %v549_v42 = vadd.f32 %v548_v41, %v1617_v2  ;;  %874 = vmatprep.mubr.f32.mxu1 %v648_v37  ;;  %v964_v41 = vsub.s32 2, %v1603_v22 }
 0x13f   : > { %875 = vmatmul.mubr.f32.gmra.mrb[28].mxu1 %v647_v39  ;;  %v649_v45 = vmax.f32 %v547_v40, 0.0  ;;  %v703_v39 = vsub.s32 1, %v1603_v22 }
 0x140   : > { %v650_v43 = vmax.f32 %v549_v42, 0.0  ;;  %v552_v44 = vpop.f32.mrb[46].mxu0 }
 0x141   : > { %v553_v46 = vadd.f32 %v552_v44, %v1615_v26  ;;  %v554_v47 = vpop.f32.mrb[47].mxu0  ;;  %v1685_v40 = vrot.slane %v1609_v24, %v703_v39  ;;  %v1690_v44 = vrot.slane %v1609_v24, %v964_v41 }
 0x142   : > { %v555_v48 = vadd.f32 %v554_v47, %v1617_v2  ;;  %879 = vmatprep.mubr.f32.mxu1 %v650_v43 }
 0x143   : > { %880 = vmatmul.mubr.f32.gmra.mrb[30].mxu1 %v649_v45  ;;  %v651_v51 = vmax.f32 %v553_v46, 0.0 }
 0x144   : > { %v652_v49 = vmax.f32 %v555_v48, 0.0  ;;  %v558_v50 = vpop.f32.mrb[48].mxu0 }
 0x145   : > { %v559_v52 = vadd.f32 %v558_v50, %v1615_v26  ;;  %v560_v53 = vpop.f32.mrb[49].mxu0 }
 0x146   : > { %v561_v54 = vadd.f32 %v560_v53, %v1617_v2  ;;  %884 = vmatprep.mubr.f32.mxu1 %v652_v49 }
 0x147   : > { %885 = vmatmul.mubr.f32.gmra.mrb[32].mxu1 %v651_v51  ;;  %v653_v57 = vmax.f32 %v559_v52, 0.0 }
 0x148   : > { %v654_v55 = vmax.f32 %v561_v54, 0.0  ;;  %v564_v56 = vpop.f32.mrb[50].mxu0 }
 0x149   : > { %v565_v58 = vadd.f32 %v564_v56, %v1615_v26  ;;  %v566_v59 = vpop.f32.mrb[51].mxu0 }
 0x14a   : > { %v567_v60 = vadd.f32 %v566_v59, %v1617_v2  ;;  %889 = vmatprep.mubr.f32.mxu1 %v654_v55 }
 0x14b   : > { %890 = vmatmul.mubr.f32.gmra.mrb[34].mxu1 %v653_v57  ;;  %v655_v63 = vmax.f32 %v565_v58, 0.0 }
 0x14c   : > { %v656_v61 = vmax.f32 %v567_v60, 0.0  ;;  %v570_v62 = vpop.f32.mrb[52].mxu0 }
 0x14d   : > { %v571_v0 = vadd.f32 %v570_v62, %v1615_v26  ;;  %v572_v1 = vpop.f32.mrb[53].mxu0 }
 0x14e   : > { %v573_v3 = vadd.f32 %v572_v1, %v1617_v2  ;;  %894 = vmatprep.mubr.f32.mxu1 %v656_v61 }
 0x14f   : > { %895 = vmatmul.mubr.f32.gmra.mrb[36].mxu1 %v655_v63  ;;  %v657_v7 = vmax.f32 %v571_v0, 0.0 }
 0x150   : > { %v658_v4 = vmax.f32 %v573_v3, 0.0  ;;  %v576_v6 = vpop.f32.mrb[54].mxu0 }
 0x151   : > { %v577_v8 = vadd.f32 %v576_v6, %v1615_v26  ;;  %v578_v9 = vpop.f32.mrb[55].mxu0 }
 0x152   : > { %v579_v10 = vadd.f32 %v578_v9, %v1617_v2  ;;  %899 = vmatprep.mubr.f32.mxu1 %v658_v4 }
 0x153   : > { %900 = vmatmul.mubr.f32.gmra.mrb[38].mxu1 %v657_v7  ;;  %v659_v13 = vmax.f32 %v577_v8, 0.0 }
 0x154   : > { %v660_v11 = vmax.f32 %v579_v10, 0.0  ;;  %v582_v12 = vpop.f32.mrb[56].mxu0 }
 0x155   : > { %v583_v14 = vadd.f32 %v582_v12, %v1615_v26  ;;  %v584_v5 = vpop.f32.mrb[57].mxu0 }
 0x156   : > { %v585_v15 = vadd.f32 %v584_v5, %v1617_v2  ;;  %904 = vmatprep.mubr.f32.mxu1 %v660_v11 }
 0x157   : > { %905 = vmatmul.mubr.f32.gmra.mrb[40].mxu1 %v659_v13  ;;  %v661_v18 = vmax.f32 %v583_v14, 0.0 }
 0x158   : > { %v662_v16 = vmax.f32 %v585_v15, 0.0  ;;  %v588_v17 = vpop.f32.mrb[58].mxu0 }
 0x159   : > { %v589_v19 = vadd.f32 %v588_v17, %v1615_v26  ;;  %v590_v20 = vpop.f32.mrb[59].mxu0 }
 0x15a   : > { %v591_v21 = vadd.f32 %v590_v20, %v1617_v2  ;;  %909 = vmatprep.mubr.f32.mxu1 %v662_v16 }
 0x15b   : > { %910 = vmatmul.mubr.f32.gmra.mrb[42].mxu1 %v661_v18  ;;  %v663_v27 = vmax.f32 %v589_v19, 0.0 }
 0x15c   : > { %v664_v23 = vmax.f32 %v591_v21, 0.0  ;;  %v594_v25 = vpop.f32.mrb[60].mxu0 }
 0x15d   : > { %v595_v28 = vadd.f32 %v594_v25, %v1615_v26  ;;  %v596_v29 = vpop.f32.mrb[61].mxu0 }
 0x15e   : > { %v597_v30 = vadd.f32 %v596_v29, %v1617_v2  ;;  %914 = vmatprep.mubr.f32.mxu1 %v664_v23 }
 0x15f   : > { %915 = vmatmul.mubr.f32.gmra.mrb[44].mxu1 %v663_v27  ;;  %v665_v33 = vmax.f32 %v595_v28, 0.0 }
 0x160   : > { %v666_v31 = vmax.f32 %v597_v30, 0.0  ;;  %v600_v32 = vpop.f32.mrb[62].mxu0 }
 0x161   : > { %v601_v34 = vadd.f32 %v600_v32, %v1615_v26  ;;  %v602_v35 = vpop.f32.mrb[63].mxu0 }
 0x162   : > { %v603_v36 = vadd.f32 %v602_v35, %v1617_v2  ;;  %919 = vmatprep.mubr.f32.mxu1 %v666_v31 }
 0x163   : > { %920 = vmatmul.mubr.f32.gmra.mrb[46].mxu1 %v665_v33  ;;  %v667_v38 = vmax.f32 %v601_v34, 0.0 }
 0x164   : > { %v668_v37 = vmax.f32 %v603_v36, 0.0 }
 0x166   : > { %924 = vmatprep.mubr.f32.mxu1 %v668_v37 }
 0x167   : > { %925 = vmatmul.mubr.f32.gmra.mrb[48].mxu1 %v667_v38 }
 0x1be   : > { %v771_v42 = vpop.f32.mrb[64].mxu0 }
 0x1bf   : > { %v772_v43 = vadd.f32 %v771_v42, %v1685_v40  ;;  %v773_v26 = vpop.f32.mrb[65].mxu0 }
 0x1c1   : > { %v930_v2 = vmax.f32 %v772_v43, 0.0 }
 0x1c2   : > { %v776_v45 = vpop.f32.mrb[66].mxu0 }
 0x1c3   : > { %v777_v46 = vadd.f32 %v776_v45, %v1685_v40  ;;  %v778_v47 = vpop.f32.mrb[67].mxu0  ;;  %v966_v48 = vmul.f32 %v1690_v44, %v930_v2 }
 0x1c5   : > { %v931_v49 = vmax.f32 %v777_v46, 0.0  ;;  %998 = vadd.xlane.f32.xlu0 %v966_v48 }
 0x1c6   : > { %v781_v50 = vpop.f32.mrb[68].mxu0 }
 0x1c7   : > { %v782_v51 = vadd.f32 %v781_v50, %v1685_v40  ;;  %v783_v52 = vpop.f32.mrb[69].mxu0  ;;  %v967_v53 = vmul.f32 %v1690_v44, %v931_v49 }
 0x1c9   : > { %v932_v54 = vmax.f32 %v782_v51, 0.0  ;;  %1000 = vadd.xlane.f32.xlu0 %v967_v53 }
 0x1ca   : > { %v786_v55 = vpop.f32.mrb[70].mxu0 }
 0x1cb   : > { %v787_v56 = vadd.f32 %v786_v55, %v1685_v40  ;;  %v788_v57 = vpop.f32.mrb[71].mxu0  ;;  %v968_v58 = vmul.f32 %v1690_v44, %v932_v54 }
 0x1cd   : > { %v933_v59 = vmax.f32 %v787_v56, 0.0  ;;  %1002 = vadd.xlane.f32.xlu1 %v968_v58 }
 0x1ce   : > { %v791_v60 = vpop.f32.mrb[72].mxu0 }
 0x1cf   : > { %v792_v61 = vadd.f32 %v791_v60, %v1685_v40  ;;  %v793_v62 = vpop.f32.mrb[73].mxu0  ;;  %v969_v63 = vmul.f32 %v1690_v44, %v933_v59 }
 0x1d1   : > { %v934_v0 = vmax.f32 %v792_v61, 0.0  ;;  %1004 = vadd.xlane.f32.xlu1 %v969_v63 }
 0x1d2   : > { %v796_v1 = vpop.f32.mrb[74].mxu0 }
 0x1d3   : > { %v797_v3 = vadd.f32 %v796_v1, %v1685_v40  ;;  %v798_v4 = vpop.f32.mrb[75].mxu0  ;;  %v970_v6 = vmul.f32 %v1690_v44, %v934_v0 }
 0x1d5   : > { %v935_v7 = vmax.f32 %v797_v3, 0.0  ;;  %1006 = vadd.xlane.f32.xlu0 %v970_v6 }
 0x1d6   : > { %v801_v8 = vpop.f32.mrb[76].mxu0 }
 0x1d7   : > { %v802_v9 = vadd.f32 %v801_v8, %v1685_v40  ;;  %v803_v10 = vpop.f32.mrb[77].mxu0  ;;  %v971_v11 = vmul.f32 %v1690_v44, %v935_v7 }
 0x1d9   : > { %v936_v12 = vmax.f32 %v802_v9, 0.0  ;;  %1008 = vadd.xlane.f32.xlu1 %v971_v11 }
 0x1da   : > { %v806_v13 = vpop.f32.mrb[0].mxu1 }
 0x1db   : > { %v807_v14 = vadd.f32 %v806_v13, %v1685_v40  ;;  %v808_v5 = vpop.f32.mrb[1].mxu1  ;;  %v972_v15 = vmul.f32 %v1690_v44, %v936_v12 }
 0x1dd   : > { %v937_v16 = vmax.f32 %v807_v14, 0.0  ;;  %1010 = vadd.xlane.f32.xlu0 %v972_v15 }
 0x1de   : > { %v811_v17 = vpop.f32.mrb[2].mxu1 }
 0x1df   : > { %v812_v18 = vadd.f32 %v811_v17, %v1685_v40  ;;  %v813_v19 = vpop.f32.mrb[3].mxu1  ;;  %v973_v20 = vmul.f32 %v1690_v44, %v937_v16 }
 0x1e1   : > { %v938_v21 = vmax.f32 %v812_v18, 0.0  ;;  %1012 = vadd.xlane.f32.xlu1 %v973_v20 }
 0x1e2   : > { %v816_v23 = vpop.f32.mrb[4].mxu1 }
 0x1e3   : > { %v817_v25 = vadd.f32 %v816_v23, %v1685_v40  ;;  %v818_v27 = vpop.f32.mrb[5].mxu1  ;;  %v974_v28 = vmul.f32 %v1690_v44, %v938_v21 }
 0x1e5   : > { %v939_v29 = vmax.f32 %v817_v25, 0.0  ;;  %1014 = vadd.xlane.f32.xlu0 %v974_v28 }
 0x1e6   : > { %v821_v30 = vpop.f32.mrb[6].mxu1 }
 0x1e7   : > { %v822_v31 = vadd.f32 %v821_v30, %v1685_v40  ;;  %v823_v32 = vpop.f32.mrb[7].mxu1  ;;  %v975_v33 = vmul.f32 %v1690_v44, %v939_v29 }
 0x1e9   : > { %v940_v34 = vmax.f32 %v822_v31, 0.0  ;;  %1016 = vadd.xlane.f32.xlu1 %v975_v33 }
 0x1ea   : > { %v826_v35 = vpop.f32.mrb[8].mxu1 }
 0x1eb   : > { %v827_v36 = vadd.f32 %v826_v35, %v1685_v40  ;;  %v828_v37 = vpop.f32.mrb[9].mxu1  ;;  %v976_v38 = vmul.f32 %v1690_v44, %v940_v34 }
 0x1ed   : > { %v941_v39 = vmax.f32 %v827_v36, 0.0  ;;  %1018 = vadd.xlane.f32.xlu0 %v976_v38 }
 0x1ee   : > { %v831_v41 = vpop.f32.mrb[10].mxu1 }
 0x1ef   : > { %v832_v42 = vadd.f32 %v831_v41, %v1685_v40  ;;  %v833_v43 = vpop.f32.mrb[11].mxu1  ;;  %v977_v26 = vmul.f32 %v1690_v44, %v941_v39 }
 0x1f1   : > { %v942_v2 = vmax.f32 %v832_v42, 0.0  ;;  %1020 = vadd.xlane.f32.xlu1 %v977_v26 }
 0x1f2   : > { %v836_v45 = vpop.f32.mrb[12].mxu1 }
 0x1f3   : > { %v837_v46 = vadd.f32 %v836_v45, %v1685_v40  ;;  %v838_v47 = vpop.f32.mrb[13].mxu1  ;;  %v978_v48 = vmul.f32 %v1690_v44, %v942_v2 }
 0x1f5   : > { %v943_v49 = vmax.f32 %v837_v46, 0.0  ;;  %1022 = vadd.xlane.f32.xlu0 %v978_v48 }
 0x1f6   : > { %v841_v50 = vpop.f32.mrb[14].mxu1 }
 0x1f7   : > { %v842_v51 = vadd.f32 %v841_v50, %v1685_v40  ;;  %v843_v52 = vpop.f32.mrb[15].mxu1  ;;  %v979_v53 = vmul.f32 %v1690_v44, %v943_v49 }
 0x1f9   : > { %v944_v54 = vmax.f32 %v842_v51, 0.0  ;;  %1024 = vadd.xlane.f32.xlu1 %v979_v53 }
 0x1fa   : > { %v846_v55 = vpop.f32.mrb[16].mxu1 }
 0x1fb   : > { %v847_v56 = vadd.f32 %v846_v55, %v1685_v40  ;;  %v848_v57 = vpop.f32.mrb[17].mxu1  ;;  %v980_v58 = vmul.f32 %v1690_v44, %v944_v54 }
 0x1fd   : > { %v945_v59 = vmax.f32 %v847_v56, 0.0  ;;  %1026 = vadd.xlane.f32.xlu0 %v980_v58 }
 0x1fe   : > { %v851_v60 = vpop.f32.mrb[18].mxu1 }
 0x1ff   : > { %v852_v61 = vadd.f32 %v851_v60, %v1685_v40  ;;  %v853_v62 = vpop.f32.mrb[19].mxu1  ;;  %v981_v63 = vmul.f32 %v1690_v44, %v945_v59 }
 0x201   : > { %v946_v0 = vmax.f32 %v852_v61, 0.0  ;;  %1028 = vadd.xlane.f32.xlu1 %v981_v63 }
 0x202   : > { %v856_v1 = vpop.f32.mrb[20].mxu1 }
 0x203   : > { %v857_v3 = vadd.f32 %v856_v1, %v1685_v40  ;;  %v858_v4 = vpop.f32.mrb[21].mxu1  ;;  %v982_v6 = vmul.f32 %v1690_v44, %v946_v0 }
 0x205   : > { %v947_v7 = vmax.f32 %v857_v3, 0.0  ;;  %1030 = vadd.xlane.f32.xlu0 %v982_v6 }
 0x206   : > { %v861_v8 = vpop.f32.mrb[22].mxu1 }
 0x207   : > { %v862_v9 = vadd.f32 %v861_v8, %v1685_v40  ;;  %v863_v10 = vpop.f32.mrb[23].mxu1  ;;  %v983_v11 = vmul.f32 %v1690_v44, %v947_v7 }
 0x209   : > { %v948_v12 = vmax.f32 %v862_v9, 0.0  ;;  %1032 = vadd.xlane.f32.xlu1 %v983_v11 }
 0x20a   : > { %v866_v13 = vpop.f32.mrb[24].mxu1 }
 0x20b   : > { %v867_v14 = vadd.f32 %v866_v13, %v1685_v40  ;;  %v868_v5 = vpop.f32.mrb[25].mxu1  ;;  %v984_v15 = vmul.f32 %v1690_v44, %v948_v12 }
 0x20d   : > { %v949_v16 = vmax.f32 %v867_v14, 0.0  ;;  %1034 = vadd.xlane.f32.xlu0 %v984_v15 }
 0x20e   : > { %v871_v17 = vpop.f32.mrb[26].mxu1 }
 0x20f   : > { %v872_v18 = vadd.f32 %v871_v17, %v1685_v40  ;;  %v873_v19 = vpop.f32.mrb[27].mxu1  ;;  %v985_v20 = vmul.f32 %v1690_v44, %v949_v16 }
 0x211   : > { %v950_v21 = vmax.f32 %v872_v18, 0.0  ;;  %1036 = vadd.xlane.f32.xlu1 %v985_v20  ;;  %v1064_v18 = vsub.s32 3, %v1603_v22 }
 0x212   : > { %v876_v23 = vpop.f32.mrb[28].mxu1 }
 0x213   : > { %v877_v25 = vadd.f32 %v876_v23, %v1685_v40  ;;  %v878_v27 = vpop.f32.mrb[29].mxu1  ;;  %v986_v28 = vmul.f32 %v1690_v44, %v950_v21  ;;  %v1757_v19 = vrot.slane %v1609_v24, %v1064_v18 }
 0x215   : > { %v951_v29 = vmax.f32 %v877_v25, 0.0  ;;  %1038 = vadd.xlane.f32.xlu0 %v986_v28 }
 0x216   : > { %v881_v30 = vpop.f32.mrb[30].mxu1 }
 0x217   : > { %v882_v31 = vadd.f32 %v881_v30, %v1685_v40  ;;  %v883_v32 = vpop.f32.mrb[31].mxu1  ;;  %v987_v33 = vmul.f32 %v1690_v44, %v951_v29 }
 0x219   : > { %v952_v34 = vmax.f32 %v882_v31, 0.0  ;;  %1040 = vadd.xlane.f32.xlu1 %v987_v33 }
 0x21a   : > { %v886_v35 = vpop.f32.mrb[32].mxu1 }
 0x21b   : > { %v887_v36 = vadd.f32 %v886_v35, %v1685_v40  ;;  %v888_v37 = vpop.f32.mrb[33].mxu1  ;;  %v988_v38 = vmul.f32 %v1690_v44, %v952_v34 }
 0x21d   : > { %v953_v39 = vmax.f32 %v887_v36, 0.0  ;;  %1042 = vadd.xlane.f32.xlu0 %v988_v38 }
 0x21e   : > { %v891_v41 = vpop.f32.mrb[34].mxu1 }
 0x21f   : > { %v892_v42 = vadd.f32 %v891_v41, %v1685_v40  ;;  %v893_v43 = vpop.f32.mrb[35].mxu1  ;;  %v989_v26 = vmul.f32 %v1690_v44, %v953_v39 }
 0x221   : > { %v954_v2 = vmax.f32 %v892_v42, 0.0  ;;  %1044 = vadd.xlane.f32.xlu1 %v989_v26 }
 0x222   : > { %v896_v45 = vpop.f32.mrb[36].mxu1 }
 0x223   : > { %v897_v46 = vadd.f32 %v896_v45, %v1685_v40  ;;  %v898_v47 = vpop.f32.mrb[37].mxu1  ;;  %v990_v48 = vmul.f32 %v1690_v44, %v954_v2 }
 0x225   : > { %v955_v49 = vmax.f32 %v897_v46, 0.0  ;;  %1046 = vadd.xlane.f32.xlu0 %v990_v48 }
 0x226   : > { %v901_v50 = vpop.f32.mrb[38].mxu1 }
 0x227   : > { %v902_v51 = vadd.f32 %v901_v50, %v1685_v40  ;;  %v903_v52 = vpop.f32.mrb[39].mxu1  ;;  %v991_v53 = vmul.f32 %v1690_v44, %v955_v49 }
 0x229   : > { %v956_v54 = vmax.f32 %v902_v51, 0.0  ;;  %1048 = vadd.xlane.f32.xlu1 %v991_v53 }
 0x22a   : > { %v906_v55 = vpop.f32.mrb[40].mxu1 }
 0x22b   : > { %v907_v56 = vadd.f32 %v906_v55, %v1685_v40  ;;  %v908_v57 = vpop.f32.mrb[41].mxu1  ;;  %v992_v58 = vmul.f32 %v1690_v44, %v956_v54 }
 0x22d   : > { %v957_v59 = vmax.f32 %v907_v56, 0.0  ;;  %1050 = vadd.xlane.f32.xlu0 %v992_v58 }
 0x22e   : > { %v911_v60 = vpop.f32.mrb[42].mxu1 }
 0x22f   : > { %v912_v61 = vadd.f32 %v911_v60, %v1685_v40  ;;  %v913_v62 = vpop.f32.mrb[43].mxu1  ;;  %v993_v63 = vmul.f32 %v1690_v44, %v957_v59 }
 0x231   : > { %v958_v0 = vmax.f32 %v912_v61, 0.0  ;;  %1052 = vadd.xlane.f32.xlu1 %v993_v63 }
 0x232   : > { %v916_v1 = vpop.f32.mrb[44].mxu1 }
 0x233   : > { %v917_v3 = vadd.f32 %v916_v1, %v1685_v40  ;;  %v918_v4 = vpop.f32.mrb[45].mxu1  ;;  %v994_v6 = vmul.f32 %v1690_v44, %v958_v0 }
 0x235   : > { %v959_v7 = vmax.f32 %v917_v3, 0.0  ;;  %1054 = vadd.xlane.f32.xlu0 %v994_v6 }
 0x236   : > { %v921_v8 = vpop.f32.mrb[46].mxu1 }
 0x237   : > { %v922_v9 = vadd.f32 %v921_v8, %v1685_v40  ;;  %v923_v10 = vpop.f32.mrb[47].mxu1  ;;  %v995_v11 = vmul.f32 %v1690_v44, %v959_v7 }
 0x239   : > { %v960_v12 = vmax.f32 %v922_v9, 0.0  ;;  %1056 = vadd.xlane.f32.xlu1 %v995_v11 }
 0x23a   : > { %v926_v13 = vpop.f32.mrb[48].mxu1 }
 0x23b   : > { %v927_v14 = vadd.f32 %v926_v13, %v1685_v40  ;;  %v928_v5 = vpop.f32.mrb[49].mxu1  ;;  %v996_v15 = vmul.f32 %v1690_v44, %v960_v12 }
 0x23d   : > { %v961_v16 = vmax.f32 %v927_v14, 0.0  ;;  %1058 = vadd.xlane.f32.xlu0 %v996_v15 }
 0x23f   : > { %v997_v17 = vmul.f32 %v1690_v44, %v961_v16 }
 0x241   : > { %1060 = vadd.xlane.f32.xlu1 %v997_v17 }
 0x252   : > { %v999_v40 = vpop.xlane.xlu0 %998 }
 0x253   : > { %v1066_v44 = vadd.f32 %v1757_v19, %v999_v40 }
 0x255   : > { %1099 = vst.msk [vmem:[%s1764_s26] sm:$0xff] %vm1098_vm2, %v1066_v44 }
 0x256   : > { %v1001_v22 = vpop.xlane.xlu0 %1000 }
 0x257   : > { %v1067_v24 = vadd.f32 %v1757_v19, %v1001_v22 }
 0x259   : > { %1100 = vst.msk [vmem:[%s1764_s26 + $0x8] sm:$0xff] %vm1098_vm2, %v1067_v24 }
 0x25a   : > { %v1003_v20 = vpop.xlane.xlu1 %1002 }
 0x25b   : > { %v1068_v21 = vadd.f32 %v1757_v19, %v1003_v20 }
 0x25d   : > { %1101 = vst.msk [vmem:[%s1764_s26 + $0x10] sm:$0xff] %vm1098_vm2, %v1068_v21 }
 0x25e   : > { %v1005_v23 = vpop.xlane.xlu1 %1004 }
 0x25f   : > { %v1069_v25 = vadd.f32 %v1757_v19, %v1005_v23 }
 0x261   : > { %1102 = vst.msk [vmem:[%s1764_s26 + $0x18] sm:$0xff] %vm1098_vm2, %v1069_v25 }
 0x262   : > { %v1007_v27 = vpop.xlane.xlu0 %1006 }
 0x263   : > { %v1070_v28 = vadd.f32 %v1757_v19, %v1007_v27 }
 0x265   : > { %1103 = vst.msk [vmem:[%s1764_s26 + $0x20] sm:$0xff] %vm1098_vm2, %v1070_v28 }
 0x266   : > { %v1009_v29 = vpop.xlane.xlu1 %1008 }
 0x267   : > { %v1071_v30 = vadd.f32 %v1757_v19, %v1009_v29 }
 0x269   : > { %1104 = vst.msk [vmem:[%s1764_s26 + $0x28] sm:$0xff] %vm1098_vm2, %v1071_v30 }
 0x26a   : > { %v1011_v31 = vpop.xlane.xlu0 %1010 }
 0x26b   : > { %v1072_v32 = vadd.f32 %v1757_v19, %v1011_v31 }
 0x26d   : > { %1105 = vst.msk [vmem:[%s1764_s26 + $0x30] sm:$0xff] %vm1098_vm2, %v1072_v32 }
 0x26e   : > { %v1013_v33 = vpop.xlane.xlu1 %1012 }
 0x26f   : > { %v1073_v34 = vadd.f32 %v1757_v19, %v1013_v33 }
 0x271   : > { %1106 = vst.msk [vmem:[%s1764_s26 + $0x38] sm:$0xff] %vm1098_vm2, %v1073_v34 }
 0x272   : > { %v1015_v35 = vpop.xlane.xlu0 %1014 }
 0x273   : > { %v1074_v36 = vadd.f32 %v1757_v19, %v1015_v35 }
 0x275   : > { %1107 = vst.msk [vmem:[%s1764_s26 + $0x40] sm:$0xff] %vm1098_vm2, %v1074_v36 }
 0x276   : > { %v1017_v37 = vpop.xlane.xlu1 %1016 }
 0x277   : > { %v1075_v38 = vadd.f32 %v1757_v19, %v1017_v37 }
 0x279   : > { %1108 = vst.msk [vmem:[%s1764_s26 + $0x48] sm:$0xff] %vm1098_vm2, %v1075_v38 }
 0x27a   : > { %v1019_v39 = vpop.xlane.xlu0 %1018 }
 0x27b   : > { %v1076_v41 = vadd.f32 %v1757_v19, %v1019_v39 }
 0x27d   : > { %1109 = vst.msk [vmem:[%s1764_s26 + $0x50] sm:$0xff] %vm1098_vm2, %v1076_v41 }
 0x27e   : > { %v1021_v42 = vpop.xlane.xlu1 %1020 }
 0x27f   : > { %v1077_v43 = vadd.f32 %v1757_v19, %v1021_v42 }
 0x281   : > { %1110 = vst.msk [vmem:[%s1764_s26 + $0x58] sm:$0xff] %vm1098_vm2, %v1077_v43 }
 0x282   : > { %v1023_v26 = vpop.xlane.xlu0 %1022 }
 0x283   : > { %v1078_v2 = vadd.f32 %v1757_v19, %v1023_v26 }
 0x285   : > { %1111 = vst.msk [vmem:[%s1764_s26 + $0x60] sm:$0xff] %vm1098_vm2, %v1078_v2 }
 0x286   : > { %v1025_v45 = vpop.xlane.xlu1 %1024 }
 0x287   : > { %v1079_v46 = vadd.f32 %v1757_v19, %v1025_v45 }
 0x289   : > { %1112 = vst.msk [vmem:[%s1764_s26 + $0x68] sm:$0xff] %vm1098_vm2, %v1079_v46 }
 0x28a   : > { %v1027_v47 = vpop.xlane.xlu0 %1026 }
 0x28b   : > { %v1080_v48 = vadd.f32 %v1757_v19, %v1027_v47 }
 0x28d   : > { %1113 = vst.msk [vmem:[%s1764_s26 + $0x70] sm:$0xff] %vm1098_vm2, %v1080_v48 }
 0x28e   : > { %v1029_v49 = vpop.xlane.xlu1 %1028 }
 0x28f   : > { %v1081_v50 = vadd.f32 %v1757_v19, %v1029_v49 }
 0x291   : > { %1114 = vst.msk [vmem:[%s1764_s26 + $0x78] sm:$0xff] %vm1098_vm2, %v1081_v50 }
 0x292   : > { %v1031_v51 = vpop.xlane.xlu0 %1030 }
 0x293   : > { %v1082_v52 = vadd.f32 %v1757_v19, %v1031_v51 }
 0x295   : > { %1115 = vst.msk [vmem:[%s1764_s26 + $0x80] sm:$0xff] %vm1098_vm2, %v1082_v52 }
 0x296   : > { %v1033_v53 = vpop.xlane.xlu1 %1032 }
 0x297   : > { %v1083_v54 = vadd.f32 %v1757_v19, %v1033_v53 }
 0x299   : > { %1116 = vst.msk [vmem:[%s1764_s26 + $0x88] sm:$0xff] %vm1098_vm2, %v1083_v54 }
 0x29a   : > { %v1035_v55 = vpop.xlane.xlu0 %1034 }
 0x29b   : > { %v1084_v56 = vadd.f32 %v1757_v19, %v1035_v55 }
 0x29d   : > { %1117 = vst.msk [vmem:[%s1764_s26 + $0x90] sm:$0xff] %vm1098_vm2, %v1084_v56 }
 0x29e   : > { %v1037_v57 = vpop.xlane.xlu1 %1036 }
 0x29f   : > { %v1085_v58 = vadd.f32 %v1757_v19, %v1037_v57 }
 0x2a1   : > { %1118 = vst.msk [vmem:[%s1764_s26 + $0x98] sm:$0xff] %vm1098_vm2, %v1085_v58 }
 0x2a2   : > { %v1039_v59 = vpop.xlane.xlu0 %1038 }
 0x2a3   : > { %v1086_v60 = vadd.f32 %v1757_v19, %v1039_v59 }
 0x2a5   : > { %1119 = vst.msk [vmem:[%s1764_s26 + $0xa0] sm:$0xff] %vm1098_vm2, %v1086_v60 }
 0x2a6   : > { %v1041_v61 = vpop.xlane.xlu1 %1040 }
 0x2a7   : > { %v1087_v62 = vadd.f32 %v1757_v19, %v1041_v61 }
 0x2a9   : > { %1120 = vst.msk [vmem:[%s1764_s26 + $0xa8] sm:$0xff] %vm1098_vm2, %v1087_v62 }
 0x2aa   : > { %v1043_v63 = vpop.xlane.xlu0 %1042 }
 0x2ab   : > { %v1088_v0 = vadd.f32 %v1757_v19, %v1043_v63 }
 0x2ad   : > { %1121 = vst.msk [vmem:[%s1764_s26 + $0xb0] sm:$0xff] %vm1098_vm2, %v1088_v0 }
 0x2ae   : > { %v1045_v1 = vpop.xlane.xlu1 %1044 }
 0x2af   : > { %v1089_v3 = vadd.f32 %v1757_v19, %v1045_v1 }
 0x2b1   : > { %1122 = vst.msk [vmem:[%s1764_s26 + $0xb8] sm:$0xff] %vm1098_vm2, %v1089_v3 }
 0x2b2   : > { %v1047_v4 = vpop.xlane.xlu0 %1046 }
 0x2b3   : > { %v1090_v6 = vadd.f32 %v1757_v19, %v1047_v4 }
 0x2b5   : > { %1123 = vst.msk [vmem:[%s1764_s26 + $0xc0] sm:$0xff] %vm1098_vm2, %v1090_v6 }
 0x2b6   : > { %v1049_v7 = vpop.xlane.xlu1 %1048 }
 0x2b7   : > { %v1091_v8 = vadd.f32 %v1757_v19, %v1049_v7 }
 0x2b9   : > { %1124 = vst.msk [vmem:[%s1764_s26 + $0xc8] sm:$0xff] %vm1098_vm2, %v1091_v8 }
 0x2ba   : > { %v1051_v9 = vpop.xlane.xlu0 %1050 }
 0x2bb   : > { %v1092_v10 = vadd.f32 %v1757_v19, %v1051_v9 }
 0x2bd   : > { %1125 = vst.msk [vmem:[%s1764_s26 + $0xd0] sm:$0xff] %vm1098_vm2, %v1092_v10 }
 0x2be   : > { %v1053_v11 = vpop.xlane.xlu1 %1052 }
 0x2bf   : > { %v1093_v12 = vadd.f32 %v1757_v19, %v1053_v11 }
 0x2c1   : > { %1126 = vst.msk [vmem:[%s1764_s26 + $0xd8] sm:$0xff] %vm1098_vm2, %v1093_v12 }
 0x2c2   : > { %v1055_v13 = vpop.xlane.xlu0 %1054 }
 0x2c3   : > { %v1094_v14 = vadd.f32 %v1757_v19, %v1055_v13 }
 0x2c5   : > { %1127 = vst.msk [vmem:[%s1764_s26 + $0xe0] sm:$0xff] %vm1098_vm2, %v1094_v14 }
 0x2c6   : > { %v1057_v5 = vpop.xlane.xlu1 %1056 }
 0x2c7   : > { %v1095_v15 = vadd.f32 %v1757_v19, %v1057_v5 }
 0x2c9   : > { %1128 = vst.msk [vmem:[%s1764_s26 + $0xe8] sm:$0xff] %vm1098_vm2, %v1095_v15 }
 0x2ca   : > { %v1059_v16 = vpop.xlane.xlu0 %1058 }
 0x2cb   : > { %v1096_v17 = vadd.f32 %v1757_v19, %v1059_v16 }
 0x2cd   : > { %1129 = vst.msk [vmem:[%s1764_s26 + $0xf0] sm:$0xff] %vm1098_vm2, %v1096_v17 }
 0x2ce   : > { %v1061_v18 = vpop.xlane.xlu1 %1060 }
 0x2cf   : > { %v1097_v40 = vadd.f32 %v1757_v19, %v1061_v18 }
 0x2d1   : > { %1130 = vst.msk [vmem:[%s1764_s26 + $0xf8] sm:$0xff] %vm1098_vm2, %v1097_v40 }
 0x2d2 PF: > { %s14_s15 = sadd.s32 1, %s1329_s15  }
 0x2d3   : > { %p11_p4 = scmp.ge.s32.totalorder %s14_s15, 6  }
 0x2d5   :  { %13 = sbr.rel (!%p11_p4) target bundleno = 1 (0x1), region = 66 }

</bundles_post_ra>
